<compile_context>
chip_gen: v6e
topology: v6e:2x2x1
jax: 0.10.0
libtpu: 0.0.40
codegen_flags: <defaults>
</compile_context>

<pallas_src>
import functools

import jax
import jax.numpy as jnp
from jax.experimental import pallas as pl
from jax.experimental.pallas import tpu as pltpu

IN_DIM = 784
H1, H2, OUT_DIM = 200, 100, 10
H1P, H2P = 256, 128          # lane-padded hidden dims (multiples of 128)


def _round_up(n, m):
    return ((n + m - 1) // m) * m


def mlp_kernel(x_ref, w1_ref, b1_ref, w2_ref, b2_ref, w3_ref, b3_ref, o_ref):
    # x arrives bf16 (preferred) or f32; astype is a no-op for bf16 input.
    x = x_ref[...].astype(jnp.bfloat16)                                 # (bt, 784)

    # lin1 + relu  (bf16 MXU inputs, f32 accumulate, f32 bias/ReLU, bf16 out)
    h1 = jnp.dot(x, w1_ref[...],
                 preferred_element_type=jnp.float32) + b1_ref[...]
    h1 = jnp.maximum(h1, 0.0).astype(jnp.bfloat16)                      # (bt, 256)

    # lin2 + relu
    h2 = jnp.dot(h1, w2_ref[...],
                 preferred_element_type=jnp.float32) + b2_ref[...]
    h2 = jnp.maximum(h2, 0.0).astype(jnp.bfloat16)                      # (bt, 128)

    # lin3 (logits stay f32)
    logits = jnp.dot(h2, w3_ref[...],
                     preferred_element_type=jnp.float32) + b3_ref[...]  # (bt, 10)

    # log_softmax over dim=1 (numerically stable)
    m = jnp.max(logits, axis=1, keepdims=True)
    z = logits - m
    lse = jnp.log(jnp.sum(jnp.exp(z), axis=1, keepdims=True))
    o_ref[...] = (z - lse).astype(o_ref.dtype)


def prepare_params(params):
    """One-time prep of PyTorch-convention (out,in) params: transpose to
    (in,out), zero-pad hidden dims to lane multiples, weights -> bf16,
    biases -> f32 (1, out) rows.  Cache and reuse the result."""
    w1 = jnp.zeros((IN_DIM, H1P), jnp.bfloat16).at[:, :H1].set(
        params["w1"].T.astype(jnp.bfloat16))
    w2 = jnp.zeros((H1P, H2P), jnp.bfloat16).at[:H1, :H2].set(
        params["w2"].T.astype(jnp.bfloat16))
    w3 = jnp.zeros((H2P, OUT_DIM), jnp.bfloat16).at[:H2, :].set(
        params["w3"].T.astype(jnp.bfloat16))
    b1 = jnp.zeros((1, H1P), jnp.float32).at[:, :H1].set(params["b1"][None, :])
    b2 = jnp.zeros((1, H2P), jnp.float32).at[:, :H2].set(params["b2"][None, :])
    b3 = params["b3"].astype(jnp.float32)[None, :]
    return {"w1": w1, "b1": b1, "w2": w2, "b2": b2, "w3": w3, "b3": b3}


def _choose_tile(B, b_tile):
    """Pick (bt, Bp): batch tile and padded batch.

    - Small B (<=512): single grid step, sublane-aligned (no wasted padding).
    - Large B: 128-aligned tile, capped at min(b_tile, 2048) for v5e's 16 MiB
      scoped-VMEM default, and additionally capped at ceil(B/2) rounded up to
      128 so the grid always has >=2 parallel steps (v7x has 2 TensorCores).
    """
    if B <= 512:
        bt = max(8, _round_up(B, 8))
        return bt, bt
    cap = max(128, (min(int(b_tile), 2048) // 128) * 128)
    half = _round_up(-(-B // 2), 128)          # ceil(B/2) rounded to 128
    bt = min(cap, half)
    Bp = _round_up(B, bt)
    return bt, Bp


@functools.partial(jax.jit, static_argnames=("b_tile",))
def net_forward(x, prep, *, b_tile=1024):
    """x: (B, 784), bf16 preferred (f32 accepted).  prep: prepare_params()."""
    B = x.shape[0]
    bt, Bp = _choose_tile(B, b_tile)
    if Bp != B:
        x = jnp.pad(x, ((0, Bp - B), (0, 0)))
    grid = (Bp // bt,)

    const = lambda i: (0, 0)   # weights/biases: VMEM-resident, DMA'd once
    flops = 2 * Bp * (IN_DIM * H1 + H1 * H2 + H2 * OUT_DIM)
    bytes_accessed = (
        (prep["w1"].size + prep["w2"].size + prep["w3"].size) * 2       # bf16
        + (prep["b1"].size + prep["b2"].size + prep["b3"].size) * 4     # f32
        + Bp * IN_DIM * x.dtype.itemsize + Bp * OUT_DIM * 4)

    out = pl.pallas_call(
        mlp_kernel,
        out_shape=jax.ShapeDtypeStruct((Bp, OUT_DIM), jnp.float32),
        grid_spec=pltpu.PrefetchScalarGridSpec(
            num_scalar_prefetch=0,
            grid=grid,
            in_specs=[
                pl.BlockSpec((bt, IN_DIM), lambda i: (i, 0)),   # x: batch-tiled
                pl.BlockSpec((IN_DIM, H1P), const),
                pl.BlockSpec((1, H1P), const),
                pl.BlockSpec((H1P, H2P), const),
                pl.BlockSpec((1, H2P), const),
                pl.BlockSpec((H2P, OUT_DIM), const),
                pl.BlockSpec((1, OUT_DIM), const),
            ],
            out_specs=pl.BlockSpec((bt, OUT_DIM), lambda i: (i, 0)),
        ),
        compiler_params=pltpu.CompilerParams(
            dimension_semantics=("parallel",)),
        cost_estimate=pl.CostEstimate(
            flops=flops,
            transcendentals=Bp * (OUT_DIM + 1),
            bytes_accessed=bytes_accessed),
    )(x, prep["w1"], prep["b1"], prep["w2"], prep["b2"], prep["w3"], prep["b3"])
    return out[:B]


def net_forward_ref_quant(x, prep):
    """Pure-JAX reference matching the kernel's bf16-input / f32-accum math."""
    def bdot(a, w):
        return jnp.dot(a.astype(jnp.bfloat16), w,
                       preferred_element_type=jnp.float32)
    h1 = jnp.maximum(bdot(x, prep["w1"]) + prep["b1"], 0.0).astype(jnp.bfloat16)
    h2 = jnp.maximum(bdot(h1, prep["w2"]) + prep["b2"], 0.0).astype(jnp.bfloat16)
    logits = bdot(h2, prep["w3"]) + prep["b3"]
    return jax.nn.log_softmax(logits, axis=1)


def net_forward_ref_f32(x, params):
    """Pure-JAX f32 reference matching the PyTorch forward exactly."""
    h1 = jax.nn.relu(x @ params["w1"].T + params["b1"])
    h2 = jax.nn.relu(h1 @ params["w2"].T + params["b2"])
    logits = h2 @ params["w3"].T + params["b3"]
    return jax.nn.log_softmax(logits, axis=1)


def init_params(key):
    """Deterministic parameter init with the nn.Linear shapes (out, in)."""
    ks = jax.random.split(key, 6)
    def lin(kw, kb, fan_in, fan_out):
        bound = 1.0 / jnp.sqrt(fan_in)
        w = jax.random.uniform(kw, (fan_out, fan_in), jnp.float32, -bound, bound)
        b = jax.random.uniform(kb, (fan_out,), jnp.float32, -bound, bound)
        return w, b
    w1, b1 = lin(ks[0], ks[1], 784, 200)
    w2, b2 = lin(ks[2], ks[3], 200, 100)
    w3, b3 = lin(ks[4], ks[5], 100, 10)
    return {"w1": w1, "b1": b1, "w2": w2, "b2": b2, "w3": w3, "b3": b3}


if __name__ == "__main__":
    key = jax.random.PRNGKey(0)
    k_x, k_p, k_x2 = jax.random.split(key, 3)

    params = init_params(k_p)
    prep = prepare_params(params)            # one-time prep, reused every call

    # --- small batch (single grid step path) ---------------------------------
    B = 16
    x_f32 = jax.random.normal(k_x, (B, 784), dtype=jnp.float32)
    x_bf16 = x_f32.astype(jnp.bfloat16)      # producer-side bf16 ingestion

    out = net_forward(x_bf16, prep)
    out = jax.block_until_ready(out)
    assert out.shape == (B, 10)

    # Exact-math check vs. a reference using the same bf16/f32-accum scheme.
    ref_q = net_forward_ref_quant(x_bf16, prep)
    assert jnp.allclose(out, ref_q, atol=2e-3, rtol=2e-3), \
        float(jnp.max(jnp.abs(out - ref_q)))

    # Semantic sanity check vs. the full-f32 PyTorch-convention forward
    # (looser tolerance due to bf16 quantization of x and weights).
    ref_f32 = net_forward_ref_f32(x_f32, params)
    assert jnp.allclose(out, ref_f32, atol=5e-2, rtol=5e-2), \
        float(jnp.max(jnp.abs(out - ref_f32)))

    # --- larger batch (>=2 parallel grid steps, 128-aligned tile path) -------
    B2 = 1000
    x2_f32 = jax.random.normal(k_x2, (B2, 784), dtype=jnp.float32)
    x2_bf16 = x2_f32.astype(jnp.bfloat16)
    out2 = jax.block_until_ready(net_forward(x2_bf16, prep))
    assert out2.shape == (B2, 10)
    ref2_q = net_forward_ref_quant(x2_bf16, prep)
    assert jnp.allclose(out2, ref2_q, atol=2e-3, rtol=2e-3), \
        float(jnp.max(jnp.abs(out2 - ref2_q)))

    print("KERNEL_OK")
</pallas_src>

<mosaic_0001>
module attributes {stable_mosaic.version = 11 : i64} {
  func.func @mlp_kernel(%arg0: i32, %arg1: memref<16x784xbf16, #tpu.memory_space<vmem>>, %arg2: memref<784x256xbf16, #tpu.memory_space<vmem>>, %arg3: memref<1x256xf32, #tpu.memory_space<vmem>>, %arg4: memref<256x128xbf16, #tpu.memory_space<vmem>>, %arg5: memref<1x128xf32, #tpu.memory_space<vmem>>, %arg6: memref<128x10xbf16, #tpu.memory_space<vmem>>, %arg7: memref<1x10xf32, #tpu.memory_space<vmem>>, %arg8: memref<16x10xf32, #tpu.memory_space<vmem>>) attributes {dimension_semantics = [#tpu.dimension_semantics<parallel>], iteration_bounds = array<i64: 1>, scalar_prefetch = 0 : i64, scratch_operands = 0 : i64, tpu.core_type = #tpu.core_type<tc>, window_params = [{transform_indices = @transform_0, window_bounds = array<i64: 16, 784>}, {pipeline_mode = #tpu.pipeline_mode<synchronous>, transform_indices = @transform_1, window_bounds = array<i64: 784, 256>}, {pipeline_mode = #tpu.pipeline_mode<synchronous>, transform_indices = @transform_2, window_bounds = array<i64: 1, 256>}, {pipeline_mode = #tpu.pipeline_mode<synchronous>, transform_indices = @transform_3, window_bounds = array<i64: 256, 128>}, {pipeline_mode = #tpu.pipeline_mode<synchronous>, transform_indices = @transform_4, window_bounds = array<i64: 1, 128>}, {pipeline_mode = #tpu.pipeline_mode<synchronous>, transform_indices = @transform_5, window_bounds = array<i64: 128, 10>}, {pipeline_mode = #tpu.pipeline_mode<synchronous>, transform_indices = @transform_6, window_bounds = array<i64: 1, 10>}, {transform_indices = @transform_7, window_bounds = array<i64: 16, 10>}]} {
    %c0 = arith.constant 0 : index
    %c0_0 = arith.constant 0 : index
    %0 = vector.load %arg1[%c0, %c0_0] : memref<16x784xbf16, #tpu.memory_space<vmem>>, vector<16x784xbf16>
    %c0_1 = arith.constant 0 : index
    %c0_2 = arith.constant 0 : index
    %1 = vector.load %arg2[%c0_1, %c0_2] : memref<784x256xbf16, #tpu.memory_space<vmem>>, vector<784x256xbf16>
    %cst = arith.constant dense<0.000000e+00> : vector<16x256xf32>
    %2 = tpu.matmul %0, %1, %cst {dimension_numbers = #tpu.dot_dimension_numbers<[1], [0], [0], [1], [0, 0, 1, 1], [], []>} : vector<16x784xbf16>, vector<784x256xbf16>, vector<16x256xf32> -> vector<16x256xf32>
    %c0_3 = arith.constant 0 : index
    %c0_4 = arith.constant 0 : index
    %3 = vector.load %arg3[%c0_3, %c0_4] : memref<1x256xf32, #tpu.memory_space<vmem>>, vector<1x256xf32>
    %4 = vector.broadcast %3 : vector<1x256xf32> to vector<16x256xf32>
    %5 = arith.addf %2, %4 : vector<16x256xf32>
    %cst_5 = arith.constant 0.000000e+00 : f32
    %6 = vector.broadcast %cst_5 : f32 to vector<16x256xf32>
    %7 = arith.maximumf %5, %6 : vector<16x256xf32>
    %8 = arith.truncf %7 : vector<16x256xf32> to vector<16x256xbf16>
    %c0_6 = arith.constant 0 : index
    %c0_7 = arith.constant 0 : index
    %9 = vector.load %arg4[%c0_6, %c0_7] : memref<256x128xbf16, #tpu.memory_space<vmem>>, vector<256x128xbf16>
    %cst_8 = arith.constant dense<0.000000e+00> : vector<16x128xf32>
    %10 = tpu.matmul %8, %9, %cst_8 {dimension_numbers = #tpu.dot_dimension_numbers<[1], [0], [0], [1], [0, 0, 1, 1], [], []>} : vector<16x256xbf16>, vector<256x128xbf16>, vector<16x128xf32> -> vector<16x128xf32>
    %c0_9 = arith.constant 0 : index
    %c0_10 = arith.constant 0 : index
    %11 = vector.load %arg5[%c0_9, %c0_10] : memref<1x128xf32, #tpu.memory_space<vmem>>, vector<1x128xf32>
    %12 = vector.broadcast %11 : vector<1x128xf32> to vector<16x128xf32>
    %13 = arith.addf %10, %12 : vector<16x128xf32>
    %cst_11 = arith.constant 0.000000e+00 : f32
    %14 = vector.broadcast %cst_11 : f32 to vector<16x128xf32>
    %15 = arith.maximumf %13, %14 : vector<16x128xf32>
    %16 = arith.truncf %15 : vector<16x128xf32> to vector<16x128xbf16>
    %c0_12 = arith.constant 0 : index
    %c0_13 = arith.constant 0 : index
    %17 = vector.load %arg6[%c0_12, %c0_13] : memref<128x10xbf16, #tpu.memory_space<vmem>>, vector<128x10xbf16>
    %cst_14 = arith.constant dense<0.000000e+00> : vector<16x10xf32>
    %18 = tpu.matmul %16, %17, %cst_14 {dimension_numbers = #tpu.dot_dimension_numbers<[1], [0], [0], [1], [0, 0, 1, 1], [], []>} : vector<16x128xbf16>, vector<128x10xbf16>, vector<16x10xf32> -> vector<16x10xf32>
    %c0_15 = arith.constant 0 : index
    %c0_16 = arith.constant 0 : index
    %19 = vector.load %arg7[%c0_15, %c0_16] : memref<1x10xf32, #tpu.memory_space<vmem>>, vector<1x10xf32>
    %20 = vector.broadcast %19 : vector<1x10xf32> to vector<16x10xf32>
    %21 = arith.addf %18, %20 : vector<16x10xf32>
    %cst_17 = arith.constant dense<0xFF800000> : vector<16xf32>
    %22 = vector.multi_reduction <maximumf>, %21, %cst_17 [1] : vector<16x10xf32> to vector<16xf32>
    %23 = vector.shape_cast %22 : vector<16xf32> to vector<16x1xf32>
    %24 = vector.broadcast %23 : vector<16x1xf32> to vector<16x10xf32>
    %25 = arith.subf %21, %24 : vector<16x10xf32>
    %26 = math.exp %25 : vector<16x10xf32>
    %cst_18 = arith.constant dense<0.000000e+00> : vector<16xf32>
    %27 = vector.multi_reduction <add>, %26, %cst_18 [1] : vector<16x10xf32> to vector<16xf32>
    %28 = vector.shape_cast %27 : vector<16xf32> to vector<16x1xf32>
    %29 = math.log %28 : vector<16x1xf32>
    %30 = vector.broadcast %29 : vector<16x1xf32> to vector<16x10xf32>
    %31 = arith.subf %25, %30 : vector<16x10xf32>
    %c0_19 = arith.constant 0 : index
    %c0_20 = arith.constant 0 : index
    %32 = vector.load %arg8[%c0_19, %c0_20] : memref<16x10xf32, #tpu.memory_space<vmem>>, vector<16x10xf32>
    tpu.vector_store %arg8[%c0_19, %c0_20], %31 {strides = array<i32>} : memref<16x10xf32, #tpu.memory_space<vmem>>, vector<16x10xf32>,
    return
  }
  func.func @transform_0(%arg0: i32) -> (i32, i32) {
    %c0_i32 = arith.constant 0 : i32
    %c0_i32_0 = arith.constant 0 : i32
    return %arg0, %c0_i32 : i32, i32
  }
  func.func @transform_1(%arg0: i32) -> (i32, i32) {
    %c0_i32 = arith.constant 0 : i32
    %c0_i32_0 = arith.constant 0 : i32
    %c0_i32_1 = arith.constant 0 : i32
    return %c0_i32, %c0_i32_0 : i32, i32
  }
  func.func @transform_2(%arg0: i32) -> (i32, i32) {
    %c0_i32 = arith.constant 0 : i32
    %c0_i32_0 = arith.constant 0 : i32
    %c0_i32_1 = arith.constant 0 : i32
    return %c0_i32, %c0_i32_0 : i32, i32
  }
  func.func @transform_3(%arg0: i32) -> (i32, i32) {
    %c0_i32 = arith.constant 0 : i32
    %c0_i32_0 = arith.constant 0 : i32
    %c0_i32_1 = arith.constant 0 : i32
    return %c0_i32, %c0_i32_0 : i32, i32
  }
  func.func @transform_4(%arg0: i32) -> (i32, i32) {
    %c0_i32 = arith.constant 0 : i32
    %c0_i32_0 = arith.constant 0 : i32
    %c0_i32_1 = arith.constant 0 : i32
    return %c0_i32, %c0_i32_0 : i32, i32
  }
  func.func @transform_5(%arg0: i32) -> (i32, i32) {
    %c0_i32 = arith.constant 0 : i32
    %c0_i32_0 = arith.constant 0 : i32
    %c0_i32_1 = arith.constant 0 : i32
    return %c0_i32, %c0_i32_0 : i32, i32
  }
  func.func @transform_6(%arg0: i32) -> (i32, i32) {
    %c0_i32 = arith.constant 0 : i32
    %c0_i32_0 = arith.constant 0 : i32
    %c0_i32_1 = arith.constant 0 : i32
    return %c0_i32, %c0_i32_0 : i32, i32
  }
  func.func @transform_7(%arg0: i32) -> (i32, i32) {
    %c0_i32 = arith.constant 0 : i32
    %c0_i32_0 = arith.constant 0 : i32
    return %arg0, %c0_i32 : i32, i32
  }
}

</mosaic_0001>

<bundles_post_ra>
// kernel: net_forward.1
= control target key start
LH: loop header
LB: loop body
LE: loop exit
PB: predicated region body
PF: predicated region fallthrough
CT: control target
= control target key end

     0   :  { %12 = vsyncpa [#allocation3], 0  ;;  %s1799_s0 = inlined_call_operand.vmem [shape: bf16[16,784], index: 0, kind: input, shape index: {}]   ;;  %s1800_s1 = inlined_call_operand.hbm [shape: bf16[784,256], index: 1, kind: input, shape index: {}]   ;;  %s1801_s2 = inlined_call_operand.vmem [shape: f32[1,256], index: 2, kind: input, shape index: {}]   ;;  %s1802_s3 = inlined_call_operand.hbm [shape: bf16[256,128], index: 3, kind: input, shape index: {}]   ;;  %s1803_s4 = inlined_call_operand.vmem [shape: f32[1,128], index: 4, kind: input, shape index: {}]   ;;  %s1804_s5 = inlined_call_operand.vmem [shape: bf16[128,10], index: 5, kind: input, shape index: {}]   ;;  %s1805_s6 = inlined_call_operand.vmem [shape: f32[1,10], index: 6, kind: input, shape index: {}]   ;;  %s1806_s7 = inlined_call_operand.hbm [shape: f32[16,10], index: 7, kind: output, shape index: {}]  }
   0x1   :  { %13 = vsyncpa [#allocation6], 0 }
   0x2   :  { %14 = vsyncpa [#allocation4], 0  ;;  %s1665_s24 = smov [#allocation2]  }
   0x3   :  { %s22_s25 = sshll.u32 %s1665_s24, 4  ;;  %s23_s25 = int_to_ptr.vmem [resolvable:$true] %s22_s25 }
   0x4   :  { %s1607_s26 = scalar_lea.vmem %s23_s25, 12544  ;;  %p1612_p1 = scmp.lt.s32.totalorder %s23_s25, %s23_s25 }
   0x5   :  { %p1608_p0 = scmp.ne.s32.totalorder %s23_s25, %s1607_s26  ;;  %p1613_p2 = scmp.lt.s32.totalorder %s1607_s26, %s1607_s26 }
   0x7   :  { %p1614_p3 = por %p1613_p2, %p1612_p1 }
   0x9   :  { %p1615_p4 = pnand %p1614_p3, %p1608_p0 }
   0xb   :  { %1618 = shalt.err (!%p1615_p4)
}
   0xc   :  { %s1666_s27 = smov 128   ;;  %s1667_s28 = smov 8  }
   0xd   :  { %28 = dma.hbm_to_vmem [thread:$0]  %s1800_s1, 12544, %s23_s25, [#allocation3], %s1666_s27, %s1666_s27, %s1667_s28  }
   0xe   :  { %s1668_s8 = smov [#allocation5]  }
   0xf   :  { %s36_s9 = sshll.u32 %s1668_s8, 4  ;;  %s37_s9 = int_to_ptr.vmem [resolvable:$true] %s36_s9 }
  0x10   :  { %s1627_s10 = scalar_lea.vmem %s37_s9, 2048  ;;  %p1632_p6 = scmp.lt.s32.totalorder %s37_s9, %s37_s9 }
  0x11   :  { %p1628_p5 = scmp.ne.s32.totalorder %s37_s9, %s1627_s10  ;;  %p1633_p7 = scmp.lt.s32.totalorder %s1627_s10, %s1627_s10 }
  0x13   :  { %p1634_p8 = por %p1633_p7, %p1632_p6 }
  0x15   :  { %p1635_p9 = pnand %p1634_p8, %p1628_p5 }
  0x17   :  { %1638 = shalt.err (!%p1635_p9)
}
  0x18   :  { %s1669_s11 = smov 64   ;;  %s1670_s12 = smov 4  }
  0x19   :  { %42 = dma.hbm_to_vmem [thread:$0]  %s1802_s3, 2048, %s37_s9, [#allocation6], %s1669_s11, %s1669_s11, %s1670_s12  }
  0x1a   :  { %1659 = dma.done.wait [#allocation3], 12544  }
  0x1b   :  { %1660 = vsyncadd [#allocation3], 4294954752 }
  0x1c   :  { %1661 = dma.done.wait [#allocation6], 2048  }
  0x1d   :  { %1662 = vsyncadd [#allocation6], 4294965248  ;;  %v1410_v0 = vld [vmem:[#allocation2 + $0x74] ss:$8 sps:$4 sm:$0xff]   ;;  %v1412_v1 = vld [vmem:[#allocation2 + $0x70] ss:$8 sps:$4 sm:$0xff]  }
  0x1e   :  { %703 = vmatprep.subr.bf16.mxu0 %v1410_v0  ;;  %v1413_v2 = vld [vmem:[#allocation2 + $0x174] ss:$8 sps:$4 sm:$0xff]   ;;  %v1415_v3 = vld [vmem:[#allocation2 + $0x170] ss:$8 sps:$4 sm:$0xff]   ;;  %v1416_v4 = vld [vmem:[#allocation2 + $0x64] ss:$8 sps:$4 sm:$0xff]  }
  0x1f   :  { %704 = vmatpush1.bf16.msra.mxu0 %v1412_v1  ;;  %v1418_v5 = vld [vmem:[#allocation2 + $0x60] ss:$8 sps:$4 sm:$0xff]   ;;  %746 = vmatprep.subr.bf16.mxu1 %v1413_v2  ;;  %v1419_v6 = vld [vmem:[#allocation2 + $0x164] ss:$8 sps:$4 sm:$0xff]   ;;  %v1422_v8 = vld [vmem:[#allocation2 + $0x54] ss:$8 sps:$4 sm:$0xff]  }
  0x20   :  { %747 = vmatpush1.bf16.msra.mxu1 %v1415_v3  ;;  %705 = vmatprep.subr.bf16.mxu0 %v1416_v4  ;;  %v1421_v7 = vld [vmem:[#allocation2 + $0x160] ss:$8 sps:$4 sm:$0xff]   ;;  %v1424_v9 = vld [vmem:[#allocation2 + $0x50] ss:$8 sps:$4 sm:$0xff]   ;;  %v1425_v10 = vld [vmem:[#allocation2 + $0x154] ss:$8 sps:$4 sm:$0xff]  }
  0x21   :  { %748 = vmatprep.subr.bf16.mxu1 %v1419_v6  ;;  %v1428_v11 = vld [vmem:[#allocation2 + $0x44] ss:$8 sps:$4 sm:$0xff]   ;;  %v1427_v12 = vld [vmem:[#allocation2 + $0x150] ss:$8 sps:$4 sm:$0xff]   ;;  %v1430_v14 = vld [vmem:[#allocation2 + $0x40] ss:$8 sps:$4 sm:$0xff]  }
  0x22   :  { %v1431_v13 = vld [vmem:[#allocation2 + $0x144] ss:$8 sps:$4 sm:$0xff]   ;;  %v1434_v15 = vld [vmem:[#allocation2 + $0x34] ss:$8 sps:$4 sm:$0xff]   ;;  %v1433_v16 = vld [vmem:[#allocation2 + $0x140] ss:$8 sps:$4 sm:$0xff]  }
  0x23   :  { %706 = vmatpush1.bf16.msra.mxu0 %v1418_v5  ;;  %v1437_v17 = vld [vmem:[#allocation2 + $0x134] ss:$8 sps:$4 sm:$0xff]   ;;  %v1436_v18 = vld [vmem:[#allocation2 + $0x30] ss:$8 sps:$4 sm:$0xff]   ;;  %v1440_v19 = vld [vmem:[#allocation2 + $0x24] ss:$8 sps:$4 sm:$0xff]  }
  0x24   :  { %707 = vmatprep.subr.bf16.mxu0 %v1422_v8  ;;  %749 = vmatpush1.bf16.msra.mxu1 %v1421_v7  ;;  %v1439_v20 = vld [vmem:[#allocation2 + $0x130] ss:$8 sps:$4 sm:$0xff]   ;;  %v1443_v21 = vld [vmem:[#allocation2 + $0x124] ss:$8 sps:$4 sm:$0xff]   ;;  %v1442_v22 = vld [vmem:[#allocation2 + $0x20] ss:$8 sps:$4 sm:$0xff]  }
  0x25   :  { %750 = vmatprep.subr.bf16.mxu1 %v1425_v10  ;;  %v1446_v23 = vld [vmem:[#allocation2 + $0x14] ss:$8 sps:$4 sm:$0xff]   ;;  %v1445_v24 = vld [vmem:[#allocation2 + $0x120] ss:$8 sps:$4 sm:$0xff]   ;;  %v1448_v26 = vld [vmem:[#allocation2 + $0x10] ss:$8 sps:$4 sm:$0xff]  }
  0x26   :  { %v1449_v25 = vld [vmem:[#allocation2 + $0x114] ss:$8 sps:$4 sm:$0xff]   ;;  %v1452_v27 = vld [vmem:[#allocation2 + $0x4] ss:$8 sps:$4 sm:$0xff]   ;;  %v1451_v28 = vld [vmem:[#allocation2 + $0x110] ss:$8 sps:$4 sm:$0xff]  }
  0x27   :  { %708 = vmatpush1.bf16.msra.mxu0 %v1424_v9  ;;  %v1455_v29 = vld [vmem:[#allocation2 + $0x104] ss:$8 sps:$4 sm:$0xff]   ;;  %v1454_v30 = vld [vmem:[#allocation2] ss:$8 sps:$4 sm:$0xff]   ;;  %v1458_v31 = vld [vmem:[#allocation2 + $0xf4] ss:$8 sps:$4 sm:$0xff]  }
  0x28   :  { %709 = vmatprep.subr.bf16.mxu0 %v1428_v11  ;;  %751 = vmatpush1.bf16.msra.mxu1 %v1427_v12  ;;  %v1457_v32 = vld [vmem:[#allocation2 + $0x100] ss:$8 sps:$4 sm:$0xff]   ;;  %v1461_v33 = vld [vmem:[#allocation2 + $0x1f4] ss:$8 sps:$4 sm:$0xff]   ;;  %v1460_v34 = vld [vmem:[#allocation2 + $0xf0] ss:$8 sps:$4 sm:$0xff]  }
  0x29   :  { %752 = vmatprep.subr.bf16.mxu1 %v1431_v13  ;;  %v1464_v35 = vld [vmem:[#allocation2 + $0xe4] ss:$8 sps:$4 sm:$0xff]   ;;  %v1463_v36 = vld [vmem:[#allocation2 + $0x1f0] ss:$8 sps:$4 sm:$0xff]   ;;  %v1466_v38 = vld [vmem:[#allocation2 + $0xe0] ss:$8 sps:$4 sm:$0xff]  }
  0x2a   :  { %v1467_v37 = vld [vmem:[#allocation2 + $0x1e4] ss:$8 sps:$4 sm:$0xff]   ;;  %v1470_v39 = vld [vmem:[#allocation2 + $0xd4] ss:$8 sps:$4 sm:$0xff]   ;;  %v1469_v40 = vld [vmem:[#allocation2 + $0x1e0] ss:$8 sps:$4 sm:$0xff]  }
  0x2b   :  { %710 = vmatpush1.bf16.msra.mxu0 %v1430_v14  ;;  %v1473_v41 = vld [vmem:[#allocation2 + $0x1d4] ss:$8 sps:$4 sm:$0xff]   ;;  %v1472_v42 = vld [vmem:[#allocation2 + $0xd0] ss:$8 sps:$4 sm:$0xff]   ;;  %v1476_v43 = vld [vmem:[#allocation2 + $0xc4] ss:$8 sps:$4 sm:$0xff]  }
  0x2c   :  { %711 = vmatprep.subr.bf16.mxu0 %v1434_v15  ;;  %753 = vmatpush1.bf16.msra.mxu1 %v1433_v16  ;;  %v1475_v44 = vld [vmem:[#allocation2 + $0x1d0] ss:$8 sps:$4 sm:$0xff]   ;;  %v1479_v45 = vld [vmem:[#allocation2 + $0x1c4] ss:$8 sps:$4 sm:$0xff]   ;;  %v1478_v46 = vld [vmem:[#allocation2 + $0xc0] ss:$8 sps:$4 sm:$0xff]  }
  0x2d   :  { %754 = vmatprep.subr.bf16.mxu1 %v1437_v17  ;;  %v1507_v47 = vld [vmem:[%s1799_s0 + $0x4] ss:$28 sps:$4 sm:$0xff]   ;;  %v1482_v48 = vld [vmem:[#allocation2 + $0xb4] ss:$8 sps:$4 sm:$0xff]   ;;  %v1514_v51 = vld [vmem:[%s1799_s0 + $0xc] ss:$28 sps:$4 sm:$0xff]  }
  0x2e   :  { %v1481_v49 = vld [vmem:[#allocation2 + $0x1c0] ss:$8 sps:$4 sm:$0xff]   ;;  %735 = vmatprep.mubr.bf16.mxu0 %v1507_v47  ;;  %v1485_v50 = vld [vmem:[#allocation2 + $0x1b4] ss:$8 sps:$4 sm:$0xff]   ;;  %v1484_v52 = vld [vmem:[#allocation2 + $0xb0] ss:$8 sps:$4 sm:$0xff]   ;;  %778 = vmatprep.mubr.bf16.mxu1 %v1514_v51 }
  0x2f   :  { %712 = vmatpush1.bf16.msra.mxu0 %v1436_v18  ;;  %v1488_v53 = vld [vmem:[#allocation2 + $0xa4] ss:$8 sps:$4 sm:$0xff]   ;;  %v1487_v54 = vld [vmem:[#allocation2 + $0x1b0] ss:$8 sps:$4 sm:$0xff]   ;;  %v1490_v56 = vld [vmem:[#allocation2 + $0xa0] ss:$8 sps:$4 sm:$0xff]  }
  0x30   :  { %713 = vmatprep.subr.bf16.mxu0 %v1440_v19  ;;  %755 = vmatpush1.bf16.msra.mxu1 %v1439_v20  ;;  %v1491_v55 = vld [vmem:[#allocation2 + $0x1a4] ss:$8 sps:$4 sm:$0xff]   ;;  %v1494_v57 = vld [vmem:[#allocation2 + $0x94] ss:$8 sps:$4 sm:$0xff]   ;;  %v1493_v58 = vld [vmem:[#allocation2 + $0x1a0] ss:$8 sps:$4 sm:$0xff]  }
  0x31   :  { %756 = vmatprep.subr.bf16.mxu1 %v1443_v21  ;;  %v1497_v59 = vld [vmem:[#allocation2 + $0x194] ss:$8 sps:$4 sm:$0xff]   ;;  %v1496_v60 = vld [vmem:[#allocation2 + $0x90] ss:$8 sps:$4 sm:$0xff]   ;;  %v1500_v61 = vld [vmem:[#allocation2 + $0x84] ss:$8 sps:$4 sm:$0xff]  }
  0x32   :  { %v1499_v62 = vld [vmem:[#allocation2 + $0x190] ss:$8 sps:$4 sm:$0xff]   ;;  %v1503_v63 = vld [vmem:[#allocation2 + $0x184] ss:$8 sps:$4 sm:$0xff]   ;;  %v1502_v0 = vld [vmem:[#allocation2 + $0x80] ss:$8 sps:$4 sm:$0xff]  }
  0x33   :  { %714 = vmatpush1.bf16.msra.mxu0 %v1442_v22  ;;  %v1511_v1 = vld [vmem:[#allocation2 + $0x274] ss:$8 sps:$4 sm:$0xff]   ;;  %v1508_v2 = vld [vmem:[#allocation2 + $0x180] ss:$8 sps:$4 sm:$0xff]   ;;  %v1509_v4 = vld [vmem:[#allocation2 + $0x270] ss:$8 sps:$4 sm:$0xff]  }
  0x34   :  { %715 = vmatprep.subr.bf16.mxu0 %v1446_v23  ;;  %757 = vmatpush1.bf16.msra.mxu1 %v1445_v24  ;;  %v1505_v3 = vld [vmem:[%s1799_s0] ss:$28 sps:$4 sm:$0xff]   ;;  %v1512_v5 = vld [vmem:[%s1799_s0 + $0x8] ss:$28 sps:$4 sm:$0xff]   ;;  %v1518_v11 = vld [vmem:[#allocation2 + $0x250] ss:$8 sps:$4 sm:$0xff]  }
  0x35   :  { %758 = vmatprep.subr.bf16.mxu1 %v1449_v25  ;;  %v1517_v6 = vld [vmem:[#allocation2 + $0x264] ss:$8 sps:$4 sm:$0xff]   ;;  %v1557_v7 = vld [vmem:[#allocation2 + $0x300] ss:$8 sps:$4 sm:$0xff]   ;;  %v1520_v10 = vld [vmem:[#allocation2 + $0x254] ss:$8 sps:$4 sm:$0xff]  }
  0x36   :  { %v1559_v8 = vld [vmem:[#allocation2 + $0x304] ss:$8 sps:$4 sm:$0xff]   ;;  %v1515_v9 = vld [vmem:[#allocation2 + $0x260] ss:$8 sps:$4 sm:$0xff]   ;;  %v1671_v12 = vmov 0   ;;  %vm699_vm0 = vcmask 130048  }
  0x37   :  { %716 = vmatpush1.bf16.msra.mxu0 %v1448_v26  ;;  %v1523_v13 = vld [vmem:[#allocation2 + $0x244] ss:$8 sps:$4 sm:$0xff]   ;;  %v1563_v14 = vld [vmem:[%s1799_s0 + $0x18] ss:$28 sps:$4 sm:$0xff]   ;;  %v1521_v16 = vld [vmem:[#allocation2 + $0x240] ss:$8 sps:$4 sm:$0xff]  }
  0x38   :  { %717 = vmatprep.subr.bf16.mxu0 %v1452_v27  ;;  %759 = vmatpush1.bf16.msra.mxu1 %v1451_v28  ;;  %v1566_v15 = vld [vmem:[%s1799_s0 + $0x14] ss:$28 sps:$4 sm:$0xff]   ;;  %v1529_v19 = vld [vmem:[#allocation2 + $0x224] ss:$8 sps:$4 sm:$0xff]   ;;  %v1527_v20 = vld [vmem:[#allocation2 + $0x220] ss:$8 sps:$4 sm:$0xff]  }
  0x39   :  { %760 = vmatprep.subr.bf16.mxu1 %v1455_v29  ;;  %v1526_v17 = vld [vmem:[#allocation2 + $0x234] ss:$8 sps:$4 sm:$0xff]   ;;  %v1524_v18 = vld [vmem:[#allocation2 + $0x230] ss:$8 sps:$4 sm:$0xff]   ;;  %v1535_v23 = vld [vmem:[#allocation2 + $0x204] ss:$8 sps:$4 sm:$0xff]  }
  0x3a   :  { %v1532_v21 = vld [vmem:[#allocation2 + $0x214] ss:$8 sps:$4 sm:$0xff]   ;;  %v1530_v22 = vld [vmem:[#allocation2 + $0x210] ss:$8 sps:$4 sm:$0xff]   ;;  %v1533_v24 = vld [vmem:[#allocation2 + $0x200] ss:$8 sps:$4 sm:$0xff]  }
  0x3b   :  { %718 = vmatpush1.bf16.msra.mxu0 %v1454_v30  ;;  %v1538_v25 = vld [vmem:[#allocation2 + $0x2f4] ss:$8 sps:$4 sm:$0xff]   ;;  %v1536_v26 = vld [vmem:[#allocation2 + $0x2f0] ss:$8 sps:$4 sm:$0xff]   ;;  %v1541_v27 = vld [vmem:[#allocation2 + $0x2e4] ss:$8 sps:$4 sm:$0xff]  }
  0x3c   :  { %719 = vmatprep.subr.bf16.mxu0 %v1458_v31  ;;  %761 = vmatpush1.bf16.msra.mxu1 %v1457_v32  ;;  %v1539_v28 = vld [vmem:[#allocation2 + $0x2e0] ss:$8 sps:$4 sm:$0xff]   ;;  %v1544_v29 = vld [vmem:[#allocation2 + $0x2d4] ss:$8 sps:$4 sm:$0xff]   ;;  %v1542_v30 = vld [vmem:[#allocation2 + $0x2d0] ss:$8 sps:$4 sm:$0xff]  }
  0x3d   :  { %762 = vmatprep.subr.bf16.mxu1 %v1461_v33  ;;  %v1547_v31 = vld [vmem:[#allocation2 + $0x2c4] ss:$8 sps:$4 sm:$0xff]   ;;  %v1545_v32 = vld [vmem:[#allocation2 + $0x2c0] ss:$8 sps:$4 sm:$0xff]   ;;  %v1550_v33 = vld [vmem:[#allocation2 + $0x2b4] ss:$8 sps:$4 sm:$0xff]  }
  0x3e   :  { %v1572_v47 = vld [vmem:[#allocation5 + $0x28] sm:$0xff]   ;;  %v1576_v51 = vld [vmem:[#allocation5 + $0x18] sm:$0xff]   ;;  %vm1673_vm1 = vmmov 0   ;;  %vm1172_vm2 = vcmask 80896  }
  0x3f   :  { %720 = vmatpush2.bf16.msra.mxu0 %v1460_v34  ;;  %v1548_v34 = vld [vmem:[#allocation2 + $0x2b0] ss:$8 sps:$4 sm:$0xff]  }
  0x40   :  { %721 = vmatprep.subr.bf16.mxu0 %v1464_v35  ;;  %763 = vmatpush2.bf16.msra.mxu1 %v1463_v36  ;;  %v1553_v35 = vld [vmem:[#allocation2 + $0x2a4] ss:$8 sps:$4 sm:$0xff]   ;;  %v1551_v36 = vld [vmem:[#allocation2 + $0x2a0] ss:$8 sps:$4 sm:$0xff]  }
  0x41   :  { %764 = vmatprep.subr.bf16.mxu1 %v1467_v37  ;;  %v1556_v37 = vld [vmem:[#allocation2 + $0x294] ss:$8 sps:$4 sm:$0xff]  }
  0x43   :  { %722 = vmatpush2.bf16.msra.mxu0 %v1466_v38  ;;  %v1554_v38 = vld [vmem:[#allocation2 + $0x290] ss:$8 sps:$4 sm:$0xff]  }
  0x44   :  { %723 = vmatprep.subr.bf16.mxu0 %v1470_v39  ;;  %765 = vmatpush2.bf16.msra.mxu1 %v1469_v40  ;;  %v1562_v39 = vld [vmem:[#allocation2 + $0x284] ss:$8 sps:$4 sm:$0xff]   ;;  %v1560_v40 = vld [vmem:[#allocation2 + $0x280] ss:$8 sps:$4 sm:$0xff]  }
  0x45   :  { %766 = vmatprep.subr.bf16.mxu1 %v1473_v41  ;;  %v1564_v41 = vld [vmem:[%s1799_s0 + $0x10] ss:$28 sps:$4 sm:$0xff]  }
  0x47   :  { %724 = vmatpush2.bf16.msra.mxu0 %v1472_v42  ;;  %v1567_v42 = vld [vmem:[#allocation5 + $0x78] sm:$0xff]  }
  0x48   :  { %725 = vmatprep.subr.bf16.mxu0 %v1476_v43  ;;  %767 = vmatpush2.bf16.msra.mxu1 %v1475_v44  ;;  %v1568_v43 = vld [vmem:[#allocation5 + $0x38] sm:$0xff]   ;;  %v1569_v44 = vld [vmem:[#allocation5 + $0x70] sm:$0xff]  }
  0x49   :  { %768 = vmatprep.subr.bf16.mxu1 %v1479_v45  ;;  %v1570_v45 = vld [vmem:[#allocation5 + $0x30] sm:$0xff]  }
  0x4b   :  { %726 = vmatpush2.bf16.msra.mxu0 %v1478_v46  ;;  %v1571_v46 = vld [vmem:[#allocation5 + $0x68] sm:$0xff]  }
  0x4c   :  { %727 = vmatprep.subr.bf16.mxu0 %v1482_v48  ;;  %769 = vmatpush2.bf16.msra.mxu1 %v1481_v49  ;;  %v1573_v48 = vld [vmem:[#allocation5 + $0x60] sm:$0xff]  }
  0x4d   :  { %770 = vmatprep.subr.bf16.mxu1 %v1485_v50  ;;  %v1574_v49 = vld [vmem:[#allocation5 + $0x20] sm:$0xff]   ;;  %v1575_v50 = vld [vmem:[#allocation5 + $0x58] sm:$0xff]  }
  0x4f   :  { %728 = vmatpush2.bf16.msra.mxu0 %v1484_v52  ;;  %v1577_v52 = vld [vmem:[#allocation5 + $0x50] sm:$0xff]  }
  0x50   :  { %729 = vmatprep.subr.bf16.mxu0 %v1488_v53  ;;  %771 = vmatpush2.bf16.msra.mxu1 %v1487_v54  ;;  %v1578_v53 = vld [vmem:[#allocation5 + $0x10] sm:$0xff]   ;;  %v1579_v54 = vld [vmem:[#allocation5 + $0x48] sm:$0xff]  }
  0x51   :  { %772 = vmatprep.subr.bf16.mxu1 %v1491_v55  ;;  %v1580_v55 = vld [vmem:[#allocation5 + $0x8] sm:$0xff]  }
  0x53   :  { %730 = vmatpush2.bf16.msra.mxu0 %v1490_v56  ;;  %v1581_v56 = vld [vmem:[#allocation5 + $0x40] sm:$0xff]  }
  0x54   :  { %731 = vmatprep.subr.bf16.mxu0 %v1494_v57  ;;  %773 = vmatpush2.bf16.msra.mxu1 %v1493_v58  ;;  %v1582_v57 = vld [vmem:[#allocation5] sm:$0xff]   ;;  %v1672_v58 = vmov 0.0  }
  0x55   :  { %774 = vmatprep.subr.bf16.mxu1 %v1497_v59  ;;  %v164_v59 = vlaneseq }
  0x57   :  { %732 = vmatpush2.bf16.msra.mxu0 %v1496_v60 }
  0x58   :  { %733 = vmatprep.subr.bf16.mxu0 %v1500_v61  ;;  %775 = vmatpush2.bf16.msra.mxu1 %v1499_v62  ;;  %v165_v61 = vshrl.u32 %v164_v59, 7 }
  0x59   :  { %776 = vmatprep.subr.bf16.mxu1 %v1503_v63 }
  0x5b   :  { %734 = vmatpush2.bf16.msra.mxu0 %v1502_v0  ;;  %v170_v0 = vsub.s32 1, %v165_v61 }
  0x5c   :  { %789 = vmatprep.subr.bf16.mxu0 %v1511_v1  ;;  %777 = vmatpush2.bf16.msra.mxu1 %v1508_v2  ;;  %v162_v1 = vld [vmem:[%s1801_s2] sm:$0x3]  ;;  %v166_v2 = vsub.s32 0, %v165_v61 }
  0x5d   :  { %846 = vmatprep.subr.bf16.mxu1 %v1559_v8 }
  0x5e   :  { %736 = vmatmul.mubr.bf16.vlgmr.msra.gmra.mxu0 %v1505_v3 }
  0x5f   :  { %790 = vmatpush1.bf16.msra.mxu0 %v1509_v4  ;;  %779 = vmatmul.mubr.bf16.vlgmr.msra.gmra.mxu1 %v1512_v5  ;;  %v171_v5 = vrot.slane %v162_v1, %v170_v0 }
  0x60   :  { %791 = vmatprep.subr.bf16.mxu0 %v1517_v6  ;;  %864 = vmatprep.mubr.bf16.mxu1 %v1671_v12  ;;  %v167_v6 = vrot.slane %v162_v1, %v166_v2 }
  0x61   :  { %847 = vmatpush1.bf16.msra.mxu1 %v1557_v7  ;;  %821 = vmatprep.mubr.bf16.mxu0 %v1566_v15 }
  0x62   :  { %1349 = vmatprep.subr.bf16.mxu1 %v1567_v42  ;;  %v1585_v42 = vld [vmem:[%s1804_s5 + $0x28] sm:$0xff]  }
  0x63   :  { %792 = vmatpush1.bf16.msra.mxu0 %v1515_v9 }
  0x64   :  { %793 = vmatprep.subr.bf16.mxu0 %v1520_v10 }
  0x67   :  { %794 = vmatpush1.bf16.msra.mxu0 %v1518_v11  ;;  %1322 = vmatmul.mubr.msk.bf16.vlgmr.msra.gmra.mxu1 %vm699_vm0, %v1563_v14 }
  0x68   :  { %795 = vmatprep.subr.bf16.mxu0 %v1523_v13  ;;  %1350 = vmatpush3.bf16.msra.mxu1 %v1568_v43  ;;  %v1586_v43 = vld [vmem:[%s1804_s5 + $0x20] sm:$0xff]  }
  0x69   :  { %1351 = vmatprep.subr.bf16.mxu1 %v1569_v44  ;;  %v1587_v44 = vld [vmem:[%s1804_s5 + $0x18] sm:$0xff]  }
  0x6b   :  { %796 = vmatpush1.bf16.msra.mxu0 %v1521_v16 }
  0x6c   :  { %797 = vmatprep.subr.bf16.mxu0 %v1526_v17  ;;  %1352 = vmatpush3.bf16.msra.mxu1 %v1570_v45  ;;  %v1588_v45 = vld [vmem:[%s1804_s5 + $0x10] sm:$0xff]  }
  0x6d   :  { %1353 = vmatprep.subr.bf16.mxu1 %v1571_v46  ;;  %v1589_v46 = vld [vmem:[%s1804_s5 + $0x8] sm:$0xff]  }
  0x6f   :  { %798 = vmatpush1.bf16.msra.mxu0 %v1524_v18 }
  0x70   :  { %799 = vmatprep.subr.bf16.mxu0 %v1529_v19  ;;  %1354 = vmatpush3.bf16.msra.mxu1 %v1572_v47  ;;  %v1590_v47 = vld [vmem:[%s1804_s5] sm:$0xff]  }
  0x71   :  { %1355 = vmatprep.subr.bf16.mxu1 %v1573_v48 }
  0x73   :  { %800 = vmatpush1.bf16.msra.mxu0 %v1527_v20 }
  0x74   :  { %801 = vmatprep.subr.bf16.mxu0 %v1532_v21  ;;  %1356 = vmatpush3.bf16.msra.mxu1 %v1574_v49 }
  0x75   :  { %1357 = vmatprep.subr.bf16.mxu1 %v1575_v50 }
  0x77   :  { %802 = vmatpush1.bf16.msra.mxu0 %v1530_v22 }
  0x78   :  { %803 = vmatprep.subr.bf16.mxu0 %v1535_v23  ;;  %1358 = vmatpush3.bf16.msra.mxu1 %v1576_v51  ;;  %v1323_v51 = vld [vmem:[%s1803_s4] ss:$0 sm:$0xff]  ;;  %s1674_s4 = smov [#allocation7]  }
  0x79   :  { %1359 = vmatprep.subr.bf16.mxu1 %v1577_v52 }
  0x7b   :  { %804 = vmatpush1.bf16.msra.mxu0 %v1533_v24 }
  0x7c   :  { %805 = vmatprep.subr.bf16.mxu0 %v1538_v25  ;;  %1360 = vmatpush3.bf16.msra.mxu1 %v1578_v53 }
  0x7d   :  { %1361 = vmatprep.subr.bf16.mxu1 %v1579_v54 }
  0x7f   :  { %806 = vmatpush2.bf16.msra.mxu0 %v1536_v26 }
  0x80   :  { %807 = vmatprep.subr.bf16.mxu0 %v1541_v27  ;;  %1362 = vmatpush3.bf16.msra.mxu1 %v1580_v55 }
  0x81   :  { %1363 = vmatprep.subr.bf16.mxu1 %v1581_v56 }
  0x83   :  { %808 = vmatpush2.bf16.msra.mxu0 %v1539_v28 }
  0x84   :  { %809 = vmatprep.subr.bf16.mxu0 %v1544_v29  ;;  %1364 = vmatpush3.bf16.msra.mxu1 %v1582_v57 }
  0x85   :  { %1380 = vmatprep.subr.bf16.mxu1 %v1672_v58 }
  0x87   :  { %810 = vmatpush2.bf16.msra.mxu0 %v1542_v30 }
  0x88   :  { %811 = vmatprep.subr.bf16.mxu0 %v1547_v31 }
  0x8b   :  { %812 = vmatpush2.bf16.msra.mxu0 %v1545_v32 }
  0x8c   :  { %813 = vmatprep.subr.bf16.mxu0 %v1550_v33 }
  0x8f   :  { %814 = vmatpush2.bf16.msra.mxu0 %v1548_v34 }
  0x90   :  { %815 = vmatprep.subr.bf16.mxu0 %v1553_v35 }
  0x93   :  { %816 = vmatpush2.bf16.msra.mxu0 %v1551_v36 }
  0x94   :  { %817 = vmatprep.subr.bf16.mxu0 %v1556_v37 }
  0x97   :  { %818 = vmatpush2.bf16.msra.mxu0 %v1554_v38 }
  0x98   :  { %819 = vmatprep.subr.bf16.mxu0 %v1562_v39  ;;  %v1583_v39 = vld [vmem:[%s1804_s5 + $0x38] sm:$0xff]  }
  0x9b   :  { %820 = vmatpush2.bf16.msra.mxu0 %v1560_v40 }
  0x9e   :  { %822 = vmatmul.mubr.bf16.vlgmr.msra.gmra.mxu0 %v1564_v41  ;;  %v1584_v41 = vld [vmem:[%s1804_s5 + $0x30] sm:$0xff]  }
 0x11e   :  { %v737_v62 = vpop.f32.mrf.mxu0 }
 0x11f   :  { %v780_v60 = vpop.f32.mrf.mxu1  ;;  %v738_v11 = vadd.f32 %v737_v62, %v167_v6 }
 0x120   :  { %v739_v3 = vpop.f32.mrf.mxu0 }
 0x121   :  { %v782_v63 = vpop.f32.mrf.mxu1  ;;  %v740_v10 = vadd.f32 %v739_v3, %v171_v5  ;;  %v781_v18 = vadd.f32 %v780_v60, %v738_v11 }
 0x122   :  { %v741_v7 = vpop.f32.mrf.mxu0 }
 0x123   :  { %v784_v4 = vpop.f32.mrf.mxu1  ;;  %v742_v13 = vadd.f32 %v741_v7, %v167_v6  ;;  %v783_v16 = vadd.f32 %v782_v63, %v740_v10 }
 0x124   :  { %v743_v12 = vpop.f32.mrf.mxu0 }
 0x125   :  { %v786_v8 = vpop.f32.mrf.mxu1  ;;  %v744_v17 = vadd.f32 %v743_v12, %v171_v5  ;;  %v785_v20 = vadd.f32 %v784_v4, %v742_v13 }
 0x127   :  { %v866_v9 = vpop.f32.mrf.mxu1  ;;  %v787_v25 = vadd.f32 %v786_v8, %v744_v17 }
 0x129   :  { %v868_v14 = vpop.f32.mrf.mxu1 }
 0x12b   :  { %v870_v23 = vpop.f32.mrf.mxu1 }
 0x12d   :  { %v872_v32 = vpop.f32.mrf.mxu1 }
 0x15e   :  { %v823_v15 = vpop.f32.mrf.mxu0 }
 0x15f   :  { %v824_v22 = vadd.f32 %v823_v15, %v781_v18 }
 0x160   :  { %v825_v19 = vpop.f32.mrf.mxu0 }
 0x161   :  { %v826_v21 = vadd.f32 %v825_v19, %v783_v16  ;;  %v867_v31 = vadd.f32 %v866_v9, %v824_v22 }
 0x162   :  { %v827_v24 = vpop.f32.mrf.mxu0 }
 0x163   :  { %v828_v26 = vadd.f32 %v827_v24, %v785_v20  ;;  %v869_v28 = vadd.f32 %v868_v14, %v826_v21  ;;  %v875_v37 = vmax.f32 %v867_v31, 0.0 }
 0x164   :  { %v829_v27 = vpop.f32.mrf.mxu0 }
 0x165   :  { %v871_v29 = vadd.f32 %v870_v23, %v828_v26  ;;  %v830_v30 = vadd.f32 %v829_v27, %v787_v25  ;;  %v876_v35 = vmax.f32 %v869_v28, 0.0 }
 0x167   :  { %v873_v33 = vadd.f32 %v872_v32, %v830_v30  ;;  %v877_v34 = vmax.f32 %v871_v29, 0.0 }
 0x169   :  { %v878_v36 = vmax.f32 %v873_v33, 0.0  ;;  %v879_v40 = vpack.c.bf16 %v877_v34, %v875_v37 }
 0x16b   :  { %v880_v38 = vpack.c.bf16 %v878_v36, %v876_v35 }
 0x16d   :  { %1048 = vmatprep.mubr.bf16.mxu1 %v880_v38 }
 0x16e   :  { %1049 = vmatmul.mubr.bf16.vlgmr.msra.gmra.mxu1 %v879_v40 }
 0x16f   :  { %1381 = vmatpush3.bf16.msra.mxu1 %v1583_v39  ;;  %1396 = vmatprep.mubr.msk.bf16.mxu1 %vm1673_vm1, %v1672_v58 }
 0x170   :  { %1382 = vmatprep.subr.bf16.mxu1 %v1672_v58 }
 0x173   :  { %1383 = vmatpush3.bf16.msra.mxu1 %v1584_v41 }
 0x174   :  { %1384 = vmatprep.subr.bf16.mxu1 %v1672_v58 }
 0x177   :  { %1385 = vmatpush3.bf16.msra.mxu1 %v1585_v42 }
 0x178   :  { %1386 = vmatprep.subr.bf16.mxu1 %v1672_v58 }
 0x17b   :  { %1387 = vmatpush3.bf16.msra.mxu1 %v1586_v43 }
 0x17c   :  { %1388 = vmatprep.subr.bf16.mxu1 %v1672_v58 }
 0x17f   :  { %1389 = vmatpush3.bf16.msra.mxu1 %v1587_v44 }
 0x180   :  { %1390 = vmatprep.subr.bf16.mxu1 %v1672_v58 }
 0x183   :  { %1391 = vmatpush3.bf16.msra.mxu1 %v1588_v45 }
 0x184   :  { %1392 = vmatprep.subr.bf16.mxu1 %v1672_v58 }
 0x187   :  { %1393 = vmatpush3.bf16.msra.mxu1 %v1589_v46 }
 0x188   :  { %1394 = vmatprep.subr.bf16.mxu1 %v1672_v58  ;;  %v1340_v58 = vld [vmem:[%s1805_s6] ss:$0 sm:$0xff]  ;;  %s1204_s6 = sshll.u32 %s1674_s4, 4  ;;  %s1205_s6 = int_to_ptr.vmem [resolvable:$true] %s1204_s6 }
 0x189   :  { %s1639_s23 = scalar_lea.vmem %s1205_s6, 256  ;;  %p1644_p11 = scmp.lt.s32.totalorder %s1205_s6, %s1205_s6 }
 0x18a   :  { %p1640_p10 = scmp.ne.s32.totalorder %s1205_s6, %s1639_s23  ;;  %p1645_p12 = scmp.lt.s32.totalorder %s1639_s23, %s1639_s23 }
 0x18b   :  { %1395 = vmatpush3.bf16.msra.mxu1 %v1590_v47 }
 0x18c   :  { %p1646_p13 = por %p1645_p12, %p1644_p11 }
 0x18e   :  { %p1647_p0 = pnand %p1646_p13, %p1640_p10 }
 0x22e   :  { %v1365_v48 = vpop.f32.mrf.mxu1 }
 0x230   :  { %v1366_v49 = vpop.f32.mrf.mxu1 }
 0x231   :  { %v1367_v50 = vadd.f32 %v1366_v49, %v1365_v48 }
 0x232   :  { %v1368_v52 = vpop.f32.mrf.mxu1 }
 0x233   :  { %v1051_v54 = vadd.f32 %v1367_v50, %v1323_v51 }
 0x234   :  { %v1369_v53 = vpop.f32.mrf.mxu1 }
 0x235   :  { %v1370_v55 = vadd.f32 %v1369_v53, %v1368_v52  ;;  %v1057_v57 = vmax.f32 %v1051_v54, 0.0 }
 0x237   :  { %v1054_v56 = vadd.f32 %v1370_v55, %v1323_v51 }
 0x239   :  { %v1058_v59 = vmax.f32 %v1054_v56, 0.0 }
 0x23b   :  { %v1059_v60 = vpack.c.bf16 %v1058_v59, %v1057_v57 }
 0x23d   :  { %1397 = vmatmul.mubr.bf16.vlgmr.msra.gmra.mxu1 %v1059_v60 }
 0x2fd   :  { %v1165_v61 = vpop.f32.mrf.mxu1 }
 0x2fe   :  { %v1166_v62 = vadd.f32 %v1340_v58, %v1165_v61 }
 0x2ff   :  { %v1398_v63 = vpop.f32.mrf.mxu1 }
 0x300   :  { %v1173_v0 = vsel %vm1172_vm2, %v1166_v62, -inf }
 0x301   :  { %1174 = vmax.xlane.f32.xlu0 %v1173_v0  ;;  %v1168_v1 = vpop.f32.mrf.mxu1 }
 0x302   :  { %v1169_v2 = vadd.f32 %v1340_v58, %v1168_v1 }
 0x303   :  { %v1399_v3 = vpop.f32.mrf.mxu1 }
 0x304   :  { %v1176_v4 = vsel %vm1172_vm2, %v1169_v2, -inf }
 0x305   :  { %1177 = vmax.xlane.f32.xlu0 %v1176_v4 }
 0x38a   :  { %v1175_v5 = vpop.xlane.xlu0 %1174 }
 0x38b   :  { %v1179_v6 = vsub.f32 %v1166_v62, %v1175_v5 }
 0x38d   :  { %v1181_v7 = vmul.f32 1.442695, %v1179_v6 }
 0x38e   :  { %v1178_v8 = vpop.xlane.xlu0 %1177 }
 0x38f   :  { %1591 = vpow2.f32 %v1181_v7  ;;  %v1180_v9 = vsub.f32 %v1169_v2, %v1178_v8 }
 0x391   :  { %v1183_v10 = vmul.f32 1.442695, %v1180_v9 }
 0x393   :  { %1593 = vpow2.f32 %v1183_v10 }
 0x39c   :  { %v1592_v11 = vpop.eup %1591 }
 0x39d   :  { %v1185_v12 = vsel %vm1172_vm2, %v1592_v11, 0.0 }
 0x39e   :  { %1186 = vadd.xlane.f32.xlu1 %v1185_v12 }
 0x3a0   :  { %v1594_v13 = vpop.eup %1593 }
 0x3a1   :  { %v1188_v14 = vsel %vm1172_vm2, %v1594_v13, 0.0 }
 0x3a2   :  { %1189 = vadd.xlane.f32.xlu1 %v1188_v14 }
 0x427   :  { %v1187_v15 = vpop.xlane.xlu1 %1186 }
 0x428   :  { %1595 = vlog2.f32 %v1187_v15 }
 0x42b   :  { %v1190_v16 = vpop.xlane.xlu1 %1189 }
 0x42c   :  { %1597 = vlog2.f32 %v1190_v16 }
 0x435   :  { %v1596_v17 = vpop.eup %1595 }
 0x436   :  { %v1192_v18 = vmul.f32 0.6931472, %v1596_v17 }
 0x438   :  { %v1195_v19 = vsub.f32 %v1179_v6, %v1192_v18 }
 0x439   :  { %v1598_v20 = vpop.eup %1597 }
 0x43a   :  { %1197 = vst.msk [vmem:[#allocation7] sm:$0xff] %vm1172_vm2, %v1195_v19  ;;  %v1194_v21 = vmul.f32 0.6931472, %v1598_v20 }
 0x43c   :  { %v1196_v22 = vsub.f32 %v1180_v9, %v1194_v21 }
 0x43e   :  { %1198 = vst.msk [vmem:[#allocation7 + $0x8] sm:$0xff] %vm1172_vm2, %v1196_v22 }
 0x43f   :  { %1650 = shalt.err (!%p1647_p0)
}
 0x440   :  { %1210 = dma.vmem_to_hbm [thread:$0]  %s1205_s6, 256, %s1806_s7, [#allocation4], %s1666_s27, %s1666_s27, %s1667_s28  }
 0x441   :  { %1663 = dma.done.wait [#allocation4], 256  }
 0x442   :  { %1664 = vsyncadd [#allocation4], 4294967040 }
 0x443   :  { %1214 = vsyncpa [#allocation3], 1 }
 0x444   :  { %1215 = vsyncpa [#allocation6], 1 }
 0x445   :  { %1216 = vsyncpa [#allocation4], 1 }

</bundles_post_ra>
